<compile_context>
chip_gen: v7x
topology: tpu7x:2x2x1
jax: 0.10.0
libtpu: 0.0.40
codegen_flags: <defaults>
</compile_context>

<pallas_src>
import math

import jax
import jax.numpy as jnp
from jax import lax
from jax.experimental import pallas as pl
from jax.experimental.pallas import tpu as pltpu


def _round_up(x, m):
    return ((x + m - 1) // m) * m


def _hw_budgets():
    """(vmem_limit_bytes, single-slab VMEM budget) — TPU-generation aware."""
    try:
        cap = pltpu.get_tpu_info().vmem_capacity_bytes
    except Exception:
        cap = 128 * 1024 * 1024
    if cap >= 96 * 1024 * 1024:                 # v5e / v6e: 128 MiB VMEM
        return 48 * 1024 * 1024, 12 * 1024 * 1024
    return 32 * 1024 * 1024, 8 * 1024 * 1024    # v7x: 64 MiB VMEM


def _pick_h_tile(N, H, W, Wp, Cin_p, Cpad, K, d, slab_budget):
    """Pick the output-H tile.  Prefers the whole image (single slab buffer)
    when it fits and the batch axis alone keeps both v7x cores busy."""
    def slab_bytes(th):
        return (th + (K - 1) * d) * Wp * Cin_p * 2      # bf16 slab
    def acc_bytes(th):
        return th * W * Cpad * 4                        # f32 accumulator
    acc_budget = 4 << 20
    if N >= 2 and slab_bytes(H) <= 2 * slab_budget and acc_bytes(H) <= acc_budget:
        return H
    best = 1
    for th in range(1, H + 1):
        if H % th:
            continue
        if th > 1 and (slab_bytes(th) > slab_budget or acc_bytes(th) > acc_budget):
            break
        best = th
        if th * W >= 2048:
            break
    if N * (H // best) < 2:        # guarantee >=2 grid steps when possible (v7x)
        for th in range(best - 1, 0, -1):
            if H % th == 0:
                best = th
                break
    return best


def _pick_bn_group(n_blocks, rows_block, Cpad, byte_budget=6 << 20):
    """How many conv tiles to fuse per BN+ReLU block (grid always divides)."""
    best = 1
    for g in range(1, n_blocks + 1):
        if n_blocks % g:
            continue
        if g > 1 and (rows_block * g * Cpad * 6 > byte_budget
                      or n_blocks // g < 2):
            continue
        best = g
    return best


# ---------------------------------------------------------------------------
# pltpu.roll sign-convention probe (cheap one-time insurance).
# ---------------------------------------------------------------------------

_ROLL_JNP_CONVENTION = None


def _roll_follows_jnp():
    """True if pltpu.roll follows jnp.roll (positive shift -> higher indices)."""
    global _ROLL_JNP_CONVENTION
    if _ROLL_JNP_CONVENTION is None:
        def k(x_ref, o_ref):
            o_ref[...] = pltpu.roll(x_ref[...], shift=1, axis=1)
        x = jnp.broadcast_to(jnp.arange(128, dtype=jnp.float32), (8, 128))
        out = pl.pallas_call(
            k, out_shape=jax.ShapeDtypeStruct((8, 128), jnp.float32))(x)
        _ROLL_JNP_CONVENTION = bool(float(out[0, 1]) == 0.0)
    return _ROLL_JNP_CONVENTION


# ---------------------------------------------------------------------------
# Kernel 1: dilated conv (manual double-buffered slab DMA, K*K MXU matmuls into
#           a VMEM f32 accumulator) fused with BN partial statistics.
# ---------------------------------------------------------------------------

def _make_conv_bn_stats_kernel(K, dil, TH, W, Wp, Cin_p, Cpad, HS, n_slots,
                               n_htiles, roll_jnp):
    ROWS = TH * W
    CH = max(8, (16384 // Cpad) // 8 * 8)     # epilogue row chunk (bounds liveness)
    # TODO(synk): for very small Cin_p, concatenate the K kw-taps into the
    # contraction dim (mini-im2col of width K) to fill the 256-deep MXU.

    def kernel(xp_hbm, w_ref, y_ref, sum_ref, sq_ref, slab_ref, sem_ref, acc_ref):
        n = pl.program_id(0)
        i = pl.program_id(1)

        def slab_copy(step, slot):
            return pltpu.make_async_copy(
                xp_hbm.at[n, pl.ds(step * TH, HS)],
                slab_ref.at[slot],
                sem_ref.at[slot])

        slot = (i & 1) if n_slots > 1 else 0

        # Prime at the first H-tile of every image (safe under megacore
        # sharding of the parallel batch axis; the H-tile axis is "arbitrary"
        # so it runs in order on one core).
        @pl.when(i == 0)
        def _():
            slab_copy(i, slot).start()

        slab_copy(i, slot).wait()

        if n_slots > 1:
            @pl.when(i + 1 < n_htiles)
            def _():
                slab_copy(i + 1, (i + 1) & 1).start()

        # K*K shifted matmuls accumulated in VMEM f32 (no vreg spills).
        first = True
        for kh in range(K):
            for kw in range(K):
                off = kw * dil
                rows = slab_ref[slot, pl.ds(kh * dil, TH)]   # (TH, Wp, Cin_p)
                if off == 0:
                    a = rows[:, :W, :]
                elif off % 8 == 0:
                    a = rows[:, off:off + W, :]              # sublane-aligned
                else:
                    # Realign the kw shift on the XLU (hidden under the MXU)
                    # instead of a misaligned sublane slice.
                    shift = (Wp - off) % Wp if roll_jnp else off
                    a = pltpu.roll(rows, shift=shift, axis=1)[:, :W, :]
                tap = jnp.dot(a.reshape(ROWS, Cin_p), w_ref[kh * K + kw],
                              preferred_element_type=jnp.float32)
                if first:
                    acc_ref[...] = tap
                    first = False
                else:
                    acc_ref[...] += tap

        # Epilogue: bf16 store of Y + fused BN partial statistics (chunked).
        s = jnp.zeros((1, Cpad), jnp.float32)
        q = jnp.zeros((1, Cpad), jnp.float32)
        for r0 in range(0, ROWS, CH):
            r1 = min(r0 + CH, ROWS)
            blk = acc_ref[r0:r1, :]
            y_ref[r0:r1, :] = blk.astype(y_ref.dtype)
            s = s + jnp.sum(blk, axis=0, keepdims=True)
            q = q + jnp.sum(blk * blk, axis=0, keepdims=True)
        sum_ref[...] = s
        sq_ref[...] = q

    return kernel


def _pallas_conv_bn_stats(xp, w_mat, *, N, H, W, Wp, TH, K, dil, vmem_limit):
    Ht = H // TH
    HS = TH + (K - 1) * dil
    Cin_p = xp.shape[-1]
    KK, _, Cpad = w_mat.shape
    ROWS = TH * W
    n_slots = 1 if Ht == 1 else 2
    needs_roll = any((kw * dil) % 8 != 0 for kw in range(K))
    roll_jnp = _roll_follows_jnp() if needs_roll else True

    kernel = _make_conv_bn_stats_kernel(K, dil, TH, W, Wp, Cin_p, Cpad, HS,
                                        n_slots, Ht, roll_jnp)
    return pl.pallas_call(
        kernel,
        out_shape=(
            jax.ShapeDtypeStruct((N, Ht, ROWS, Cpad), jnp.bfloat16),  # conv Y
            jax.ShapeDtypeStruct((N, Ht, 1, Cpad), jnp.float32),      # partial sum
            jax.ShapeDtypeStruct((N, Ht, 1, Cpad), jnp.float32),      # partial sumsq
        ),
        grid=(N, Ht),
        in_specs=[
            pl.BlockSpec(memory_space=pl.ANY),            # raw HBM ref, manual DMA
            pl.BlockSpec((KK, Cin_p, Cpad), lambda n, i: (0, 0, 0),
                         pipeline_mode=pl.Buffered(1)),   # resident weights
        ],
        out_specs=(
            pl.BlockSpec((None, None, ROWS, Cpad), lambda n, i: (n, i, 0, 0)),
            pl.BlockSpec((None, None, 1, Cpad), lambda n, i: (n, i, 0, 0)),
            pl.BlockSpec((None, None, 1, Cpad), lambda n, i: (n, i, 0, 0)),
        ),
        scratch_shapes=[
            pltpu.VMEM((n_slots, HS, Wp, Cin_p), jnp.bfloat16),  # halo slab(s)
            pltpu.SemaphoreType.DMA((n_slots,)),
            pltpu.VMEM((ROWS, Cpad), jnp.float32),               # f32 accumulator
        ],
        compiler_params=pltpu.CompilerParams(
            dimension_semantics=("parallel", "arbitrary"),
            vmem_limit_bytes=vmem_limit),
    )(xp, w_mat)


# ---------------------------------------------------------------------------
# Kernel 2: BN (training-mode stats, affine) + ReLU as one FMA + max.
# ---------------------------------------------------------------------------

def _bn_relu_kernel(y_ref, scale_ref, bias_ref, o_ref):
    # bf16 load, f32 FMA + ReLU, f32 store.
    o_ref[...] = jnp.maximum(
        y_ref[...].astype(jnp.float32) * scale_ref[...] + bias_ref[...], 0.0)


def _pallas_bn_relu(y3, scale, bias, g, vmem_limit):
    NB, ROWS, Cpad = y3.shape
    return pl.pallas_call(
        _bn_relu_kernel,
        out_shape=jax.ShapeDtypeStruct((NB, ROWS, Cpad), jnp.float32),
        grid=(NB // g,),
        in_specs=[
            pl.BlockSpec((g, ROWS, Cpad), lambda i: (i, 0, 0)),
            pl.BlockSpec((1, Cpad), lambda i: (0, 0)),
            pl.BlockSpec((1, Cpad), lambda i: (0, 0)),
        ],
        out_specs=pl.BlockSpec((g, ROWS, Cpad), lambda i: (i, 0, 0)),
        compiler_params=pltpu.CompilerParams(
            dimension_semantics=("parallel",),
            vmem_limit_bytes=vmem_limit),
    )(y3, scale, bias)


# ---------------------------------------------------------------------------
# Module wrapper
# ---------------------------------------------------------------------------

class ASPPModulePallas:
    """JAX/Pallas port of ASPP_module(inplanes, planes, dilation) forward."""

    def __init__(self, inplanes, planes, dilation, key):
        if dilation == 1:
            kernel_size, padding = 1, 0
        else:
            kernel_size, padding = 3, dilation
        self.inplanes = inplanes
        self.planes = planes
        self.dilation = dilation
        self.K = kernel_size
        self.pad = padding
        self.eps = 1e-5
        # Conv weight init: normal(0, sqrt(2 / (K*K*Cout))), as in _init_weight.
        n = kernel_size * kernel_size * planes
        std = math.sqrt(2.0 / n)
        self.weight = std * jax.random.normal(
            key, (planes, inplanes, kernel_size, kernel_size), jnp.float32)
        # BN affine params: weight=1, bias=0 (as in _init_weight).
        self.gamma = jnp.ones((planes,), jnp.float32)
        self.beta = jnp.zeros((planes,), jnp.float32)

    def __call__(self, x):
        N, Cin, H, W = x.shape
        assert Cin == self.inplanes
        K, d, pad, Cout = self.K, self.dilation, self.pad, self.planes
        Cin_p = _round_up(Cin, 8)      # sublane-align the contraction dim
        Cpad = _round_up(Cout, 128)    # lane-dense output stores
        M = N * H * W
        vmem_limit, slab_budget = _hw_budgets()

        # Host glue: NCHW -> NHWC with the bf16 cast folded into the zero pad.
        # No halo'd H-tiles are materialized here; the conv kernel DMAs them
        # straight out of this padded slab.
        Wp = _round_up(W + 2 * pad, 8)
        x_nhwc = jnp.transpose(x, (0, 2, 3, 1)).astype(jnp.bfloat16)
        xp = jnp.pad(x_nhwc, ((0, 0), (pad, pad),
                              (pad, Wp - W - pad), (0, Cin_p - Cin)))

        TH = _pick_h_tile(N, H, W, Wp, Cin_p, Cpad, K, d, slab_budget)
        Ht = H // TH

        # weight (Cout, Cin, K, K) -> (K*K, Cin_p, Cpad), taps ordered (kh, kw).
        w = jnp.transpose(self.weight, (2, 3, 1, 0)).reshape(K * K, Cin, Cout)
        w = jnp.pad(w, ((0, 0), (0, Cin_p - Cin), (0, Cpad - Cout)))
        w = w.astype(jnp.bfloat16)

        # Pallas: dilated conv + fused BN statistics.
        y, psum, psq = _pallas_conv_bn_stats(
            xp, w, N=N, H=H, W=W, Wp=Wp, TH=TH, K=K, dil=d,
            vmem_limit=vmem_limit)

        # BN finalize (tiny per-channel math) in plain JAX.
        s = jnp.sum(psum, axis=(0, 1, 2))
        sq = jnp.sum(psq, axis=(0, 1, 2))
        mean = s / M
        # TODO(synk): single-pass E[y^2]-E[y]^2 loses precision when |mean|>>std;
        # clamped at 0 so rounding can never give negative variance.
        var = jnp.maximum(sq / M - mean * mean, 0.0)
        inv_std = lax.rsqrt(var + self.eps)
        gamma = jnp.pad(self.gamma, (0, Cpad - Cout))
        beta = jnp.pad(self.beta, (0, Cpad - Cout))
        scale = (gamma * inv_std).reshape(1, Cpad)
        bias = (beta - mean * gamma * inv_std).reshape(1, Cpad)

        # Pallas: BN + ReLU (one FMA + max) over lane-dense tiles.
        g = _pick_bn_group(N * Ht, TH * W, Cpad)
        out3 = _pallas_bn_relu(y.reshape(N * Ht, TH * W, Cpad), scale, bias, g,
                               vmem_limit)

        # TODO(synk): if the consumer accepts NHWC (and planes % 128 == 0) this
        # transpose + channel-slice pass over the full output can be skipped.
        out = out3.reshape(N, H, W, Cpad)[..., :Cout]
        return jnp.transpose(out, (0, 3, 1, 2))


# ---------------------------------------------------------------------------
# Demo / self-check
# ---------------------------------------------------------------------------

def _reference_forward(x, mod):
    """Pure-JAX reference using the same bf16-rounded conv operands."""
    xr = x.astype(jnp.bfloat16).astype(jnp.float32)
    wr = mod.weight.astype(jnp.bfloat16).astype(jnp.float32)
    conv = lax.conv_general_dilated(
        xr, wr, window_strides=(1, 1),
        padding=[(mod.pad, mod.pad), (mod.pad, mod.pad)],
        rhs_dilation=(mod.dilation, mod.dilation),
        dimension_numbers=("NCHW", "OIHW", "NCHW"),
        precision=lax.Precision.HIGHEST)
    mean = conv.mean(axis=(0, 2, 3), keepdims=True)
    var = conv.var(axis=(0, 2, 3), keepdims=True)
    bn = (conv - mean) / jnp.sqrt(var + mod.eps)
    bn = bn * mod.gamma.reshape(1, -1, 1, 1) + mod.beta.reshape(1, -1, 1, 1)
    return jnp.maximum(bn, 0.0)


if __name__ == "__main__":
    key = jax.random.PRNGKey(0)
    kx, kw1, kw2 = jax.random.split(key, 3)

    N, Cin, H, W = 2, 4, 16, 16
    Cout = 8
    x2 = jax.random.normal(kx, (N, Cin, H, W), jnp.float32)
    x1 = x2[:1]   # N=1 case exercises the multi-H-tile double-buffered DMA path

    cases = ((2, kw1, x2), (1, kw2, x2), (2, kw1, x1))
    for dilation, kmod, xin in cases:
        mod = ASPPModulePallas(Cin, Cout, dilation, kmod)
        out = mod(xin)
        jax.block_until_ready(out)

        ref = _reference_forward(xin, mod)
        assert out.shape == (xin.shape[0], Cout, H, W), out.shape
        err = float(jnp.max(jnp.abs(out - ref)))
        # Conv operands and the Y intermediate are bf16 (MXU / HBM-traffic
        # optimization); BN statistics are accumulated in f32.
        assert err < 5e-2, f"dilation={dilation}, N={xin.shape[0]}: err {err}"

    print("KERNEL_OK")
</pallas_src>

<mosaic_0001>
module attributes {stable_mosaic.version = 11 : i64} {
  func.func @k(%arg0: memref<8x128xf32, #tpu.memory_space<vmem>>, %arg1: memref<8x128xf32, #tpu.memory_space<vmem>>) attributes {dimension_semantics = [], scalar_prefetch = 0 : i64, scratch_operands = 0 : i64, tpu.core_type = #tpu.core_type<tc>} {
    %c0 = arith.constant 0 : index
    %c0_0 = arith.constant 0 : index
    %0 = vector.load %arg0[%c0, %c0_0] : memref<8x128xf32, #tpu.memory_space<vmem>>, vector<8x128xf32>
    %c1_i32 = arith.constant 1 : i32
    %1 = tpu.dynamic_rotate %0 by %c1_i32 dim 1 : vector<8x128xf32>, i32 -> vector<8x128xf32>
    %c0_1 = arith.constant 0 : index
    %c0_2 = arith.constant 0 : index
    %2 = vector.load %arg1[%c0_1, %c0_2] : memref<8x128xf32, #tpu.memory_space<vmem>>, vector<8x128xf32>
    tpu.vector_store %arg1[%c0_1, %c0_2], %1 {strides = array<i32>} : memref<8x128xf32, #tpu.memory_space<vmem>>, vector<8x128xf32>,
    return
  }
}

</mosaic_0001>

<bundles_post_ra>
// kernel: tpu_custom_call.1
= control target key start
LH: loop header
LB: loop body
LE: loop exit
PB: predicated region body
PF: predicated region fallthrough
CT: control target
= control target key end

     0   :  { %6 = vsyncpa [#allocation3], 0  ;;  %s128_s0 = inlined_call_operand.hbm [shape: f32[8,128], index: 0, kind: input, shape index: {}]   ;;  %s129_s1 = inlined_call_operand.hbm [shape: f32[8,128], index: 1, kind: output, shape index: {}]  }
   0x1   :  { %7 = vsyncpa [#allocation4], 0  ;;  %s91_s6 = smov [#allocation2]   ;;  %s43_s10 = scalar_lea.hbm %s128_s0, 128 }
   0x2   :  { %s14_s7 = sshll.u32 %s91_s6, 4  ;;  %p44_p0 = scmp.ne.s32.totalorder %s128_s0, %s43_s10  ;;  %s15_s7 = int_to_ptr.vmem [resolvable:$true] %s14_s7 }
   0x3   :  { %p47_p1 = scmp.lt.u32.totalorder %s43_s10, %s128_s0 }
   0x5   :  { %p49_p2 = pnand %p47_p1, %p44_p0 }
   0x7   :  { %52 = shalt.err (!%p49_p2)
}
   0x8   :  { %s53_s15 = scalar_lea.vmem %s15_s7, 128  ;;  %p58_p4 = scmp.lt.s32.totalorder %s15_s7, %s15_s7 }
   0x9   :  { %p54_p3 = scmp.ne.s32.totalorder %s15_s7, %s53_s15  ;;  %p59_p5 = scmp.lt.s32.totalorder %s53_s15, %s53_s15 }
   0xb   :  { %p60_p6 = por %p59_p5, %p58_p4 }
   0xd   :  { %p61_p7 = pnand %p60_p6, %p54_p3 }
   0xf   :  { %64 = shalt.err (!%p61_p7)
}
  0x10   :  { %17 = dma.hbm_to_vmem [thread:$0]  %s128_s0, 128, %s15_s7, [#allocation3]  }
  0x11   :  { %87 = dma.done.wait [#allocation3], 128  }
  0x12   :  { %88 = vsyncadd [#allocation3], 4294967168  ;;  %v21_v0 = vld [vmem:[#allocation2] sm:$0xff]  ;;  %s92_s18 = smov 1   ;;  %s93_s19 = smov [#allocation5]  }
  0x13   :  { %22 = vrot.lane.b32.xlu0 %v21_v0, %s92_s18  ;;  %s31_s20 = sshll.u32 %s93_s19, 4  ;;  %s32_s20 = int_to_ptr.vmem [resolvable:$true] %s31_s20 }
  0x14   :  { %s65_s21 = scalar_lea.vmem %s32_s20, 128  ;;  %p70_p9 = scmp.lt.s32.totalorder %s32_s20, %s32_s20 }
  0x15   :  { %p66_p8 = scmp.ne.s32.totalorder %s32_s20, %s65_s21  ;;  %p71_p10 = scmp.lt.s32.totalorder %s65_s21, %s65_s21 }
  0x17   :  { %p72_p11 = por %p71_p10, %p70_p9 }
  0x19   :  { %p73_p12 = pnand %p72_p11, %p66_p8 }
  0x85   :  { %v23_v1 = vpop.permute.xlu0 %22 }
  0x86   :  { %24 = vst [vmem:[#allocation5] sm:$0xff] %v23_v1 }
  0x87   :  { %76 = shalt.err (!%p73_p12)
}
  0x88   :  { %s77_s0 = scalar_lea.hbm %s129_s1, 128 }
  0x89   :  { %p78_p13 = scmp.ne.s32.totalorder %s129_s1, %s77_s0  ;;  %p81_p0 = scmp.lt.u32.totalorder %s77_s0, %s129_s1 }
  0x8b   :  { %p83_p1 = pnand %p81_p0, %p78_p13 }
  0x8d   :  { %86 = shalt.err (!%p83_p1)
}
  0x8e   :  { %34 = dma.vmem_to_hbm [thread:$0]  %s32_s20, 128, %s129_s1, [#allocation4]  }
  0x8f   :  { %89 = dma.done.wait [#allocation4], 128  }
  0x90   :  { %90 = vsyncadd [#allocation4], 4294967168 }
  0x91   :  { %38 = vsyncpa [#allocation3], 1 }
  0x92   :  { %39 = vsyncpa [#allocation4], 1 }

</bundles_post_ra>
